<compile_context>
chip_gen: v7x
topology: tpu7x:2x2x1
jax: 0.10.0
libtpu: 0.0.40
codegen_flags: <defaults>
</compile_context>

<pallas_src>
import numpy as np
import jax
import jax.numpy as jnp
from jax.experimental import pallas as pl
from jax.experimental.pallas import tpu as pltpu


def _zono_relu_kernel(x_ref, y_ref, eps_ref):
    """x_ref: (B, T) f32 tile. Row 0 = center, rows 1: = noise terms."""
    x = x_ref[...]
    B = x.shape[0]
    center = x[0:1, :]                                           # (1, T)

    # Sequential per-row |.| accumulation matches the reference's reduce order.
    if B > 1:
        noise = jnp.abs(x[1:2, :])
        for i in range(2, B):
            noise = noise + jnp.abs(x[i:i + 1, :])
    else:
        noise = jnp.zeros_like(center)

    lb = center - noise
    ub = center + noise

    neg = ub <= 0.0            # definitely negative -> output 0
    pos = lb >= 0.0            # definitely positive -> identity
    cross = jnp.logical_not(jnp.logical_or(neg, pos))

    # Least-area slope on crossing cells: slope = ub / (ub - lb) in (0, 1].
    # Exact f32 divide; on crossing cells denom = ub - lb > 0 so no clip needed.
    denom = jnp.where(cross, ub - lb, 1.0)
    slope = ub / denom

    # Fused per-cell scale: 0 on negative, slope on crossing, 1 on positive.
    scale = jnp.where(neg, 0.0, jnp.where(cross, slope, 1.0))       # (1, T)
    # new eps magnitude = 0.5 * (1 - slope) * ub on crossing cells.
    new_eps = jnp.where(cross, ((1.0 - slope) * ub) * 0.5, 0.0)     # (1, T)

    # Single pass of stores: center row (with new-eps fixup), then noise rows.
    y_ref[0:1, :] = center * scale + new_eps
    if B > 1:
        y_ref[1:, :] = x[1:, :] * scale
    eps_ref[...] = new_eps


def _round_up(n, m):
    return ((n + m - 1) // m) * m


def _pick_tile(N, B):
    # Double-buffered VMEM per lane: input (B) + y out (B) + eps out (1), f32, x2 buffers.
    bytes_per_lane = (2 * B + 1) * 4 * 2
    budget = 40 * 1024 * 1024            # stays under the 48 MiB scoped limit (v7x-safe)
    max_tile = max(128, (budget // bytes_per_lane) // 128 * 128)
    if N <= 256:
        return N                         # single full-extent block (no 128 alignment needed)
    # >= 2 grid steps so the "parallel" axis can shard across both v7x TensorCores.
    half = _round_up(-(-N // 2), 128)
    return min(max_tile, half)


def zonotope_relu(x):
    """x: (B, *spatial). Row 0 is the center, rows 1: the noise terms.
    Returns (B + num_new_eps, *spatial)."""
    x = jnp.asarray(x, jnp.float32)
    B = x.shape[0]
    spatial = x.shape[1:]
    N = int(np.prod(spatial))

    TILE_N = _pick_tile(N, B)
    grid = (pl.cdiv(N, TILE_N),)

    xf = x.reshape(B, N)                 # lane-dense, unpadded; last block may be partial

    y, eps = pl.pallas_call(
        _zono_relu_kernel,
        grid=grid,
        in_specs=[pl.BlockSpec((B, TILE_N), lambda i: (0, i))],
        out_specs=(
            pl.BlockSpec((B, TILE_N), lambda i: (0, i)),
            pl.BlockSpec((1, TILE_N), lambda i: (0, i)),
        ),
        out_shape=(
            jax.ShapeDtypeStruct((B, N), jnp.float32),
            jax.ShapeDtypeStruct((1, N), jnp.float32),
        ),
        compiler_params=pltpu.CompilerParams(
            dimension_semantics=("parallel",),
            # v7x has only 64 MiB VMEM per TC -> keep <= 48 MiB; v5e/v6e could go higher.
            vmem_limit_bytes=48 * 1024 * 1024,
        ),
    )(xf)

    # ---- epilogue: data-dependent number of new eps rows ---------------------
    # TODO(synk): the number of appended epsilon rows is data-dependent (dynamic
    # output shape), so this scalar count readback + concat cannot live inside jit.
    eps_flat = eps[0]                                    # (N,) stays on device
    mask = eps_flat != 0.0
    num_act = int(jnp.sum(mask))                         # single scalar D->H transfer
    if num_act > 0:
        row_id = jnp.cumsum(mask.astype(jnp.int32)) - 1  # r-th nonzero -> row r
        onehot = (row_id[None, :] == jnp.arange(num_act, dtype=jnp.int32)[:, None]) \
            & mask[None, :]
        rows = onehot.astype(jnp.float32) * eps_flat[None, :]    # built on device
        out_flat = jnp.concatenate([y, rows], axis=0)
    else:
        out_flat = y
    return out_flat.reshape((out_flat.shape[0],) + spatial)


# ---------------- pure-numpy reference mirroring the PyTorch module ---------
def _reference(x_np):
    x = np.array(x_np, dtype=np.float32)
    noise = np.abs(x[1:]).sum(axis=0)
    lb, ub = x[0] - noise, x[0] + noise
    neg, pos = (ub <= 0), (lb >= 0)
    y = x * (~neg).astype(np.float32)
    mask = ~(neg | pos)
    if not mask.any():
        return y
    m = mask.astype(np.float32)
    with np.errstate(divide="ignore", invalid="ignore"):
        st = ub / (ub - lb)
    slope = np.clip(st, 0.0, 1.0)
    imask = (slope > st).astype(np.float32)
    intercept = -(slope * lb) * imask + (1.0 - slope) * ub * (1.0 - imask)
    xt = slope * y * m + (1.0 - m) * y
    new_eps = np.ones_like(x[0]) * intercept * 0.5 * m
    xt[0] += new_eps
    idx = np.nonzero(new_eps != 0)
    num = idx[0].shape[0]
    rows = np.zeros((num,) + x[0].shape, dtype=np.float32)
    rows[(np.arange(num),) + idx] = 1.0
    rows *= new_eps
    return np.concatenate([xt, rows], axis=0)


def _run_case(shape, key):
    k_center, k_noise = jax.random.split(key)
    center = jax.random.normal(k_center, (1,) + shape[1:], jnp.float32)
    noise_terms = 0.3 * jax.random.normal(k_noise, (shape[0] - 1,) + shape[1:],
                                          jnp.float32)
    x = jnp.concatenate([center, noise_terms], axis=0)
    out = jax.block_until_ready(zonotope_relu(x))
    ref = _reference(np.asarray(x))
    assert out.shape == ref.shape, (out.shape, ref.shape)
    np.testing.assert_allclose(np.asarray(out), ref, rtol=2e-5, atol=2e-5)


if __name__ == "__main__":
    key = jax.random.PRNGKey(0)
    k1, k2 = jax.random.split(key)
    # 1 center + 4 eps rows, N = 4*16*16 = 1024 -> two 512-lane grid steps.
    _run_case((5, 4, 16, 16), k1)
    # Ragged spatial size (N = 300) -> 256-lane tile with a partial last block.
    _run_case((5, 3, 10, 10), k2)
    print("KERNEL_OK")
</pallas_src>

<mosaic_0001>
module attributes {stable_mosaic.version = 11 : i64} {
  func.func @_zono_relu_kernel(%arg0: i32, %arg1: memref<5x512xf32, #tpu.memory_space<vmem>>, %arg2: memref<5x512xf32, #tpu.memory_space<vmem>>, %arg3: memref<1x512xf32, #tpu.memory_space<vmem>>) attributes {dimension_semantics = [#tpu.dimension_semantics<parallel>], iteration_bounds = array<i64: 2>, scalar_prefetch = 0 : i64, scratch_operands = 0 : i64, tpu.core_type = #tpu.core_type<tc>, window_params = [{transform_indices = @transform_0, window_bounds = array<i64: 5, 512>}, {transform_indices = @transform_1, window_bounds = array<i64: 5, 512>}, {transform_indices = @transform_2, window_bounds = array<i64: 1, 512>}]} {
    %c0 = arith.constant 0 : index
    %c0_0 = arith.constant 0 : index
    %0 = vector.load %arg1[%c0, %c0_0] : memref<5x512xf32, #tpu.memory_space<vmem>>, vector<5x512xf32>
    %1 = vector.extract_strided_slice %0 {offsets = [0, 0], sizes = [1, 512], strides = [1, 1]} : vector<5x512xf32> to vector<1x512xf32>
    %2 = vector.extract_strided_slice %0 {offsets = [1, 0], sizes = [1, 512], strides = [1, 1]} : vector<5x512xf32> to vector<1x512xf32>
    %3 = math.absf %2 : vector<1x512xf32>
    %4 = vector.extract_strided_slice %0 {offsets = [2, 0], sizes = [1, 512], strides = [1, 1]} : vector<5x512xf32> to vector<1x512xf32>
    %5 = math.absf %4 : vector<1x512xf32>
    %6 = arith.addf %3, %5 : vector<1x512xf32>
    %7 = vector.extract_strided_slice %0 {offsets = [3, 0], sizes = [1, 512], strides = [1, 1]} : vector<5x512xf32> to vector<1x512xf32>
    %8 = math.absf %7 : vector<1x512xf32>
    %9 = arith.addf %6, %8 : vector<1x512xf32>
    %10 = vector.extract_strided_slice %0 {offsets = [4, 0], sizes = [1, 512], strides = [1, 1]} : vector<5x512xf32> to vector<1x512xf32>
    %11 = math.absf %10 : vector<1x512xf32>
    %12 = arith.addf %9, %11 : vector<1x512xf32>
    %13 = arith.subf %1, %12 : vector<1x512xf32>
    %14 = arith.addf %1, %12 : vector<1x512xf32>
    %cst = arith.constant 0.000000e+00 : f32
    %15 = vector.broadcast %cst : f32 to vector<1x512xf32>
    %16 = arith.cmpf ole, %14, %15 : vector<1x512xf32>
    %cst_1 = arith.constant 0.000000e+00 : f32
    %17 = vector.broadcast %cst_1 : f32 to vector<1x512xf32>
    %18 = arith.cmpf oge, %13, %17 : vector<1x512xf32>
    %19 = arith.ori %16, %18 : vector<1x512xi1>
    %cst_2 = arith.constant dense<true> : vector<1x512xi1>
    %20 = arith.xori %19, %cst_2 : vector<1x512xi1>
    %21 = arith.subf %14, %13 : vector<1x512xf32>
    %cst_3 = arith.constant 1.000000e+00 : f32
    %22 = vector.broadcast %cst_3 : f32 to vector<1x512xf32>
    %23 = arith.select %20, %21, %22 : vector<1x512xi1>, vector<1x512xf32>
    %24 = arith.divf %14, %23 : vector<1x512xf32>
    %cst_4 = arith.constant 1.000000e+00 : f32
    %25 = vector.broadcast %cst_4 : f32 to vector<1x512xf32>
    %26 = arith.select %20, %24, %25 : vector<1x512xi1>, vector<1x512xf32>
    %cst_5 = arith.constant 0.000000e+00 : f32
    %27 = vector.broadcast %cst_5 : f32 to vector<1x512xf32>
    %28 = arith.select %16, %27, %26 : vector<1x512xi1>, vector<1x512xf32>
    %cst_6 = arith.constant 1.000000e+00 : f32
    %29 = vector.broadcast %cst_6 : f32 to vector<1x512xf32>
    %30 = arith.subf %29, %24 : vector<1x512xf32>
    %31 = arith.mulf %30, %14 : vector<1x512xf32>
    %cst_7 = arith.constant 5.000000e-01 : f32
    %32 = vector.broadcast %cst_7 : f32 to vector<1x512xf32>
    %33 = arith.mulf %31, %32 : vector<1x512xf32>
    %cst_8 = arith.constant 0.000000e+00 : f32
    %34 = vector.broadcast %cst_8 : f32 to vector<1x512xf32>
    %35 = arith.select %20, %33, %34 : vector<1x512xi1>, vector<1x512xf32>
    %36 = arith.mulf %1, %28 : vector<1x512xf32>
    %37 = arith.addf %36, %35 : vector<1x512xf32>
    %c0_9 = arith.constant 0 : index
    %c0_10 = arith.constant 0 : index
    %38 = vector.load %arg2[%c0_9, %c0_10] : memref<5x512xf32, #tpu.memory_space<vmem>>, vector<1x512xf32>
    tpu.vector_store %arg2[%c0_9, %c0_10], %37 {strides = array<i32>} : memref<5x512xf32, #tpu.memory_space<vmem>>, vector<1x512xf32>,
    %39 = vector.extract_strided_slice %0 {offsets = [1, 0], sizes = [4, 512], strides = [1, 1]} : vector<5x512xf32> to vector<4x512xf32>
    %40 = vector.broadcast %28 : vector<1x512xf32> to vector<4x512xf32>
    %41 = arith.mulf %39, %40 : vector<4x512xf32>
    %c1 = arith.constant 1 : index
    %c0_11 = arith.constant 0 : index
    %42 = vector.load %arg2[%c1, %c0_11] : memref<5x512xf32, #tpu.memory_space<vmem>>, vector<4x512xf32>
    tpu.vector_store %arg2[%c1, %c0_11], %41 {strides = array<i32>} : memref<5x512xf32, #tpu.memory_space<vmem>>, vector<4x512xf32>,
    %c0_12 = arith.constant 0 : index
    %c0_13 = arith.constant 0 : index
    %43 = vector.load %arg3[%c0_12, %c0_13] : memref<1x512xf32, #tpu.memory_space<vmem>>, vector<1x512xf32>
    tpu.vector_store %arg3[%c0_12, %c0_13], %35 {strides = array<i32>} : memref<1x512xf32, #tpu.memory_space<vmem>>, vector<1x512xf32>,
    return
  }
  func.func @transform_0(%arg0: i32) -> (i32, i32) {
    %c0_i32 = arith.constant 0 : i32
    %c0_i32_0 = arith.constant 0 : i32
    return %c0_i32, %arg0 : i32, i32
  }
  func.func @transform_1(%arg0: i32) -> (i32, i32) {
    %c0_i32 = arith.constant 0 : i32
    %c0_i32_0 = arith.constant 0 : i32
    return %c0_i32, %arg0 : i32, i32
  }
  func.func @transform_2(%arg0: i32) -> (i32, i32) {
    %c0_i32 = arith.constant 0 : i32
    %c0_i32_0 = arith.constant 0 : i32
    return %c0_i32, %arg0 : i32, i32
  }
}

</mosaic_0001>

<bundles_post_ra>
// kernel: tpu_custom_call.1
= control target key start
LH: loop header
LB: loop body
LE: loop exit
PB: predicated region body
PF: predicated region fallthrough
CT: control target
= control target key end

     0   :  { %8 = vsyncpa [#allocation3], 0  ;;  %s1045_s0 = inlined_call_operand.hbm [shape: f32[5,1024], index: 0, kind: input, shape index: {}]   ;;  %s1046_s1 = inlined_call_operand.hbm [shape: f32[5,1024], index: 1, kind: output, shape index: {0}]   ;;  %s1047_s2 = inlined_call_operand.hbm [shape: f32[1,1024], index: 2, kind: output, shape index: {1}]  }
   0x1   :  { %10 = vsyncpa [#allocation3 + $0x1], 0 }
   0x2   :  { %11 = vsyncpa [#allocation4], 0 }
   0x3   :  { %13 = vsyncpa [#allocation4 + $0x1], 0 }
   0x4   :  { %14 = vsyncpa [#allocation7], 0 }
   0x5   :  { %16 = vsyncpa [#allocation7 + $0x1], 0  ;;  %s763_s9 = smov 0   ;;  %s765_s10 = smov 0  }
   0x6   :  { %s767_s11 = smov 0   ;;  %s769_s12 = smov 0  }
   0x7 LB: > { %s784_s13 = sadd.s32 4294967295, %s741_s12   ;;  %s531_s14 = sadd.s32 4294967294, %s741_s12   ;;  %s741_s12 = sphi %s769_s12, %s1070_s12   ;;  %s737_s11 = sphi %s767_s11, %s1069_s11   ;;  %s733_s10 = sphi %s765_s10, %s1068_s10   ;;  %s729_s9 = sphi %s763_s9, %s1067_s9  }
   0x8   : > { %s788_s15 = sadd.s32 1, %s741_s12   ;;  %s29_s16 = sadd.s32 1, %s737_s11 }
   0x9   : > { %s26_s17 = ssub.s32 %s741_s12, %s788_s15  ;;  %p36_p0 = scmp.ne.s32.totalorder %s737_s11, %s733_s10 }
   0xa   : > { %p27_p1 = scmp.eq.s32.totalorder %s26_s17, 0  ;;  %p37_p2 = scmp.eq.s32.totalorder %s741_s12, 0 }
   0xb   : > { %p42_p3 = scmp.ne.s32.totalorder %s733_s10, %s729_s9  ;;  %p43_p4 = scmp.eq.s32.totalorder %s784_s13, 0 }
   0xc   : > { %s800_s18 = scalar_select %p27_p1, %s737_s11, %s29_s16  }
   0xd   : > { %p802_p5 = por %p37_p2, %p36_p0  ;;  %p806_p6 = por %p43_p4, %p42_p3 }
   0xe   : > { %p66_p7 = scmp.eq.s32.totalorder %s784_s13, 1  ;;  %p72_p8 = scmp.eq.s32.totalorder %s531_s14, 1 }
   0xf   : > { %p569_p10 = scmp.lt.s32.totalorder %s741_s12, 2  ;;  %s118_s23 = sand.u32 1, %s737_s11  }
  0x10   : > { %p813_p11 = por %p66_p7, %p36_p0  ;;  %p817_p12 = por %p72_p8, %p42_p3 }
  0x11   : > { %s549_s24 = sshll.u32 %s741_s12, 9  ;;  %s534_s25 = sshll.u32 %s118_s23, 5 }
  0x12   : > { %s1051_s21 = scalar_select %p813_p11, 1, 0 }
  0x13   : > { %s1052_s22 = scalar_select %p817_p12, 1, 0 }
  0x14   : > { %s826_s28 = scalar_lea.hbm %s1045_s0, %s549_s24  ;;  %s122_s29 = scalar_lea.vmem [#allocation2], %s534_s25 }
  0x15   : > { %s130_s30 = sshll.u32 %s122_s29, 4  ;;  %p830_p13 = pnand %p569_p10, %p802_p5  ;;  %s834_s30 = int_to_ptr.vmem [resolvable:$true] %s130_s30 }
  0x16   : > { %s119_s4 = scalar_lea.sflag [#allocation3], %s118_s23  ;;  %s613_s5 = scalar_lea.hbm %s826_s28, 512 }
  0x17   : > { %p614_p2 = scmp.ne.s32.totalorder %s826_s28, %s613_s5  ;;  %p615_p3 = pneg %p830_p13 }
  0x18   : > { %s618_s8 = scalar_lea.hbm %s1045_s0, 1024  ;;  %p619_p5 = scmp.lt.u32.totalorder %s826_s28, %s1045_s0 }
  0x19   : > { %p616_p4 = pnand %p615_p3, %p614_p2  ;;  %p620_p8 = scmp.lt.u32.totalorder %s618_s8, %s613_s5 }
  0x1a   : > { %p622_p9 = scmp.lt.u32.totalorder %s613_s5, %s826_s28 }
  0x1b   : > { %p617_p7 = pneg %p616_p4  ;;  %p621_p10 = por %p620_p8, %p619_p5 }
  0x1d   : > { %p623_p0 = por %p622_p9, %p621_p10 }
  0x1f   : > { %p624_p1 = pnand %p623_p0, %p617_p7 }
  0x21   : > { %627 = shalt.err (!%p624_p1)
}
  0x22   : > { %s628_s17 = scalar_lea.vmem %s834_s30, 512  ;;  %s743_s19 = smov [#allocation2]  }
  0x23   : > { %p629_p2 = scmp.ne.s32.totalorder %s834_s30, %s628_s17  ;;  %s633_s23 = sshll.u32 %s743_s19, 4  ;;  %s634_s23 = int_to_ptr.vmem [resolvable:$false] %s633_s23 }
  0x24   : > { %s635_s24 = scalar_lea.vmem %s634_s23, 1024  ;;  %p636_p11 = scmp.lt.s32.totalorder %s834_s30, %s634_s23 }
  0x25   : > { %p631_p4 = pnand %p629_p2, %p615_p3  ;;  %p637_p5 = scmp.lt.s32.totalorder %s635_s24, %s628_s17 }
  0x27   : > { %p632_p12 = pneg %p631_p4  ;;  %p638_p8 = por %p637_p5, %p636_p11 }
  0x29   : > { %p639_p9 = pnand %p638_p8, %p632_p12 }
  0x2b   : > { %642 = shalt.err (!%p639_p9)
}
  0x2c   : > { %561 = dma.hbm_to_vmem [thread:$0]  (!%p830_p13), %s826_s28, 512, %s834_s30, %s119_s4  }
  0x2d   : > { %p1054_p0 = scmp.lt.s32.totalorder %s741_s12, 3  ;;  %p1055_p1 = scmp.ge.s32.totalorder %s741_s12, 1 }
  0x2f   : > { %p136_p3 = pnand %p1055_p1, %p1054_p0 }
  0x30   : > { %s868_s25 = sand.u32 (!%p136_p3), 1, %s733_s10  }
  0x31   : > { %139 = sbr.rel (%p136_p3) target bundleno = 149 (0x95), region = 24  ;;  %s538_s26 = sshll.u32 (!%p136_p3), %s868_s25, 5 }
  0x32   : > { %s142_s27 = scalar_lea.sflag (!%p136_p3), [#allocation3], %s868_s25  ;;  %s145_s29 = scalar_lea.vmem (!%p136_p3), [#allocation2], %s538_s26 }
  0x38   : > { %716 = dma.done.wait (%p806_p6), %s142_s27, 512  }
  0x39   : > { %718 = vsyncadd (%p806_p6), %s142_s27, 4294966784  ;;  %v878_v0 = vld [vmem:[%s145_s29] sm:$0x1f]  ;;  %v880_v1 = vld [vmem:[%s145_s29 + $0x8] sm:$0x1f]  ;;  %vm744_vm12 = vmmov 1   ;;  %v315_v58 = vlaneseq }
  0x3a   : > { %v882_v2 = vld [vmem:[%s145_s29 + $0x10] sm:$0x1f]  ;;  %v884_v3 = vld [vmem:[%s145_s29 + $0x18] sm:$0x1f]  ;;  %v178_v4 = vand.u32 2147483647, %v878_v0 }
  0x3b   : > { %v179_v5 = vand.u32 2147483647, %v880_v1  ;;  %v180_v6 = vand.u32 2147483647, %v882_v2  ;;  %v181_v7 = vand.u32 2147483647, %v884_v3 }
  0x3c   : > { %v186_v8 = vrot.slane %v178_v4, 1  ;;  %v198_v10 = vrot.slane %v178_v4, 2  ;;  %v210_v18 = vrot.slane %v178_v4, 3  ;;  %v745_v56 = vmov 1966171168   ;;  %s540_s20 = sshll.u32 %s868_s25, 2 }
  0x3d   : > { %v187_v9 = vrot.slane %v179_v5, 1  ;;  %v199_v11 = vrot.slane %v179_v5, 2  ;;  %v188_v12 = vrot.slane %v180_v6, 1  ;;  %v189_v13 = vrot.slane %v181_v7, 1  ;;  %s163_s28 = scalar_lea.vmem [#allocation5], %s538_s26  ;;  %s170_s3 = scalar_lea.vmem [#allocation6], %s540_s20 }
  0x3e   : > { %v200_v14 = vrot.slane %v180_v6, 2  ;;  %v201_v15 = vrot.slane %v181_v7, 2  ;;  %v194_v16 = vadd.f32 %v186_v8, %v178_v4  ;;  %v211_v19 = vrot.slane %v179_v5, 3  ;;  %s415_s30 = sshll.u32 %s163_s28, 4  ;;  %s429_s4 = sshll.u32 %s170_s3, 4  ;;  %s967_s30 = int_to_ptr.vmem [resolvable:$true] %s415_s30  ;;  %s969_s4 = int_to_ptr.vmem [resolvable:$true] %s429_s4 }
  0x3f   : > { %v195_v17 = vadd.f32 %v187_v9, %v179_v5  ;;  %v196_v20 = vadd.f32 %v188_v12, %v180_v6  ;;  %v197_v21 = vadd.f32 %v189_v13, %v181_v7  ;;  %v212_v22 = vrot.slane %v180_v6, 3  ;;  %s551_s5 = sshll.u32 %s784_s13, 6  ;;  %s550_s6 = sshll.u32 %s784_s13, 9 }
  0x40   : > { %v213_v23 = vrot.slane %v181_v7, 3  ;;  %v206_v24 = vadd.f32 %v198_v10, %v194_v16  ;;  %v313_v57 = vunpack.c.l.s4 %v745_v56  ;;  %v316_v60 = vshrl.u32 %v315_v58, 7  ;;  %s975_s14 = scalar_lea.hbm %s1047_s2, %s551_s5  ;;  %s981_s17 = scalar_lea.hbm %s1046_s1, %s550_s6 }
  0x41   : > { %v207_v25 = vadd.f32 %v199_v11, %v195_v17  ;;  %v208_v26 = vadd.f32 %v200_v14, %v196_v20  ;;  %v209_v27 = vadd.f32 %v201_v15, %v197_v21  ;;  %s401_s19 = scalar_lea.sflag [#allocation7], %s868_s25  ;;  %s643_s23 = scalar_lea.vmem %s969_s4, 64 }
  0x42   : > { %v218_v28 = vadd.f32 %v210_v18, %v206_v24  ;;  %v314_v59 = vunpack.c.0.s8 %v313_v57  ;;  %v343_v6 = vsub.s32 0, %v316_v60  ;;  %p644_p6 = scmp.ne.s32.totalorder %s969_s4, %s643_s23  ;;  %p1064_p11 = scmp.ne.s32.totalorder %s1051_s21, 0 }
  0x43   : > { %v219_v29 = vadd.f32 %v211_v19, %v207_v25  ;;  %v220_v30 = vadd.f32 %v212_v22, %v208_v26  ;;  %v221_v31 = vadd.f32 %v213_v23, %v209_v27  ;;  %s746_s24 = smov [#allocation6]  }
  0x44   : > { %v226_v32 = vrot.slane %v218_v28, 1  ;;  %v929_v11 = vsub.s32 %v314_v59, %v316_v60  ;;  %p645_p12 = pnand %p644_p6, %p1064_p11  ;;  %s647_s26 = sshll.u32 %s746_s24, 4  ;;  %s648_s26 = int_to_ptr.vmem [resolvable:$false] %s647_s26 }
  0x45   : > { %v227_v33 = vrot.slane %v219_v29, 1  ;;  %v228_v34 = vrot.slane %v220_v30, 1  ;;  %v229_v35 = vrot.slane %v221_v31, 1  ;;  %s649_s27 = scalar_lea.vmem %s648_s26, 128  ;;  %p650_p7 = scmp.lt.s32.totalorder %s969_s4, %s648_s26 }
  0x46   : > { %v234_v36 = vsub.f32 %v878_v0, %v226_v32  ;;  %v238_v38 = vadd.f32 %v226_v32, %v878_v0  ;;  %p646_p13 = pneg %p645_p12  ;;  %p651_p10 = scmp.lt.s32.totalorder %s649_s27, %s643_s23 }
  0x47   : > { %v235_v37 = vsub.f32 %v880_v1, %v227_v33  ;;  %v239_v39 = vadd.f32 %v227_v33, %v880_v1  ;;  %v236_v40 = vsub.f32 %v882_v2, %v228_v34  ;;  %v237_v41 = vsub.f32 %v884_v3, %v229_v35 }
  0x48   : > { %v240_v42 = vadd.f32 %v228_v34, %v882_v2  ;;  %v241_v43 = vadd.f32 %v229_v35, %v884_v3  ;;  %vm242_vm0 = vcmp.le.f32.partialorder %v238_v38, 0.0  ;;  %vm246_vm2 = vcmp.ge.f32.partialorder %v234_v36, 0.0  ;;  %p652_p2 = por %p651_p10, %p650_p7 }
  0x49   : > { %vm243_vm1 = vcmp.le.f32.partialorder %v239_v39, 0.0  ;;  %vm247_vm3 = vcmp.ge.f32.partialorder %v235_v37, 0.0  ;;  %vm248_vm6 = vcmp.ge.f32.partialorder %v236_v40, 0.0  ;;  %vm249_vm7 = vcmp.ge.f32.partialorder %v237_v41, 0.0  ;;  %vm250_vm8 = vmor %vm242_vm0, %vm246_vm2 }
  0x4a   : > { %vm244_vm4 = vcmp.le.f32.partialorder %v240_v42, 0.0  ;;  %vm245_vm5 = vcmp.le.f32.partialorder %v241_v43, 0.0  ;;  %vm251_vm9 = vmor %vm243_vm1, %vm247_vm3  ;;  %v258_v44 = vsub.f32 %v238_v38, %v234_v36  ;;  %v259_v45 = vsub.f32 %v239_v39, %v235_v37  ;;  %p653_p4 = pnand %p652_p2, %p646_p13 }
  0x4b   : > { %vm252_vm10 = vmor %vm244_vm4, %vm248_vm6  ;;  %v260_v46 = vsub.f32 %v240_v42, %v236_v40  ;;  %v261_v48 = vsub.f32 %v241_v43, %v237_v41 }
  0x4c   : > { %vm253_vm11 = vmor %vm245_vm5, %vm249_vm7 }
  0x4d   : > { %vm902_vm13 = vmxor %vm250_vm8, %vm744_vm12 }
  0x4e   : > { %vm906_vm14 = vmxor %vm251_vm9, %vm744_vm12  ;;  %v262_v50 = vsel %vm902_vm13, %v258_v44, 1.0 }
  0x4f   : > { %vm912_vm15 = vmxor %vm252_vm10, %vm744_vm12  ;;  %v263_v52 = vsel %vm906_vm14, %v259_v45, 1.0  ;;  %605 = vrcp.f32 %v262_v50 }
  0x50   : > { %vm918_vm2 = vmxor %vm253_vm11, %vm744_vm12  ;;  %v264_v54 = vsel %vm912_vm15, %v260_v46, 1.0  ;;  %607 = vrcp.f32 %v263_v52 }
  0x51   : > { %v265_v55 = vsel %vm918_vm2, %v261_v48, 1.0  ;;  %609 = vrcp.f32 %v264_v54 }
  0x52   : > { %611 = vrcp.f32 %v265_v55 }
  0x59   : > { %v606_v61 = vpop.eup %605 }
  0x5a   : > { %v608_v62 = vpop.eup %607  ;;  %v267_v63 = vmul.f32 %v606_v61, %v238_v38 }
  0x5b   : > { %v610_v4 = vpop.eup %609  ;;  %v269_v5 = vmul.f32 %v608_v62, %v239_v39 }
  0x5c   : > { %v612_v7 = vpop.eup %611  ;;  %v271_v8 = vmul.f32 %v610_v4, %v240_v42  ;;  %v274_v9 = vsel %vm902_vm13, %v267_v63, 1.0  ;;  %v282_v10 = vsub.f32 1.0, %v267_v63 }
  0x5d   : > { %v273_v12 = vmul.f32 %v612_v7, %v241_v43  ;;  %v275_v13 = vsel %vm906_vm14, %v269_v5, 1.0  ;;  %v278_v14 = vsel %vm242_vm0, 0.0, %v274_v9  ;;  %v283_v15 = vsub.f32 1.0, %v269_v5 }
  0x5e   : > { %v276_v16 = vsel %vm912_vm15, %v271_v8, 1.0  ;;  %v279_v17 = vsel %vm243_vm1, 0.0, %v275_v13  ;;  %v284_v18 = vsub.f32 1.0, %v271_v8  ;;  %v286_v19 = vmul.f32 %v282_v10, %v238_v38 }
  0x5f   : > { %v277_v20 = vsel %vm918_vm2, %v273_v12, 1.0  ;;  %v280_v21 = vsel %vm244_vm4, 0.0, %v276_v16  ;;  %v285_v22 = vsub.f32 1.0, %v273_v12  ;;  %v287_v23 = vmul.f32 %v283_v15, %v239_v39 }
  0x60   : > { %v281_v24 = vsel %vm245_vm5, 0.0, %v277_v20  ;;  %v288_v25 = vmul.f32 %v284_v18, %v240_v42  ;;  %v290_v26 = vmul.f32 0.5, %v286_v19  ;;  %v298_v27 = vmul.f32 %v278_v14, %v878_v0 }
  0x61   : > { %v289_v28 = vmul.f32 %v285_v22, %v241_v43  ;;  %v291_v29 = vmul.f32 0.5, %v287_v23  ;;  %v299_v30 = vmul.f32 %v279_v17, %v880_v1  ;;  %v300_v31 = vmul.f32 %v280_v21, %v882_v2 }
  0x62   : > { %v292_v32 = vmul.f32 0.5, %v288_v25  ;;  %v294_v33 = vsel %vm902_vm13, %v290_v26, 0.0  ;;  %v301_v34 = vmul.f32 %v281_v24, %v884_v3  ;;  %v344_v35 = vrot.slane %v278_v14, %v343_v6 }
  0x63   : > { %v293_v36 = vmul.f32 0.5, %v289_v28  ;;  %v295_v37 = vsel %vm906_vm14, %v291_v29, 0.0  ;;  %v302_v38 = vadd.f32 %v298_v27, %v294_v33  ;;  %v348_v39 = vrot.slane %v279_v17, %v343_v6 }
  0x64   : > { %v296_v40 = vsel %vm912_vm15, %v292_v32, 0.0  ;;  %v303_v41 = vadd.f32 %v299_v30, %v295_v37  ;;  %v357_v42 = vmul.f32 %v344_v35, %v878_v0  ;;  %v352_v43 = vrot.slane %v280_v21, %v343_v6 }
  0x65   : > { %v297_v44 = vsel %vm918_vm2, %v293_v36, 0.0  ;;  %v304_v45 = vadd.f32 %v300_v31, %v296_v40  ;;  %v358_v46 = vmul.f32 %v348_v39, %v880_v1  ;;  %v356_v47 = vrot.slane %v281_v24, %v343_v6 }
  0x66   : > { %v305_v48 = vadd.f32 %v301_v34, %v297_v44  ;;  %v310_v49 = vcombine.low %v302_v38, %v303_v41  ;;  %361 = vst [vmem:[%s163_s28] sm:$0x1e] %v357_v42  ;;  %v359_v50 = vmul.f32 %v352_v43, %v882_v2  ;;  %v369_v51 = vcombine.low %v294_v33, %v295_v37 }
  0x67   : > { %362 = vst [vmem:[%s163_s28 + $0x8] sm:$0x1e] %v358_v46  ;;  %v360_v0 = vmul.f32 %v356_v47, %v884_v3  ;;  %v370_v52 = vcombine.low %v296_v40, %v297_v44  ;;  %vm337_vm0 = vcmp.lt.s32.totalorder %v315_v58, 512 }
  0x68   : > { %v311_v53 = vcombine.low %v304_v45, %v305_v48  ;;  %v318_v54 = vrot.slane %v310_v49, %v929_v11  ;;  %363 = vst [vmem:[%s163_s28 + $0x10] sm:$0x1e] %v359_v50  ;;  %v377_v1 = vrot.slane %v369_v51, %v929_v11 }
  0x69   : > { %364 = vst [vmem:[%s163_s28 + $0x18] sm:$0x1e] %v360_v0  ;;  %v384_v55 = vrot.slane %v370_v52, %v929_v11 }
  0x6a   : > { %v325_v2 = vrot.slane %v311_v53, %v929_v11 }
  0x6b   : > { %v385_v56 = vcombine.low %v377_v1, %v384_v55 }
  0x6c   : > { %v326_v3 = vcombine.low %v318_v54, %v325_v2 }
  0x6d   : > { %v392_v57 = vrot.slane %v385_v56, %v929_v11 }
  0x6e   : > { %v333_v59 = vrot.slane %v326_v3, %v929_v11 }
  0x6f   : > { %394 = vst.msk [vmem:[%s170_s3] sm:$0xf] %vm337_vm0, %v392_v57 }
  0x70   : > { %339 = vst.msk [vmem:[%s163_s28] ss:$8 sm:$0xf] %vm337_vm0, %v333_v59 }
  0x71   : > { %656 = shalt.err (!%p653_p4)
}
  0x72   : > { %s657_s29 = scalar_lea.hbm %s975_s14, 64  ;;  %s661_s3 = scalar_lea.hbm %s1047_s2, 128 }
  0x73   : > { %p658_p5 = scmp.ne.s32.totalorder %s975_s14, %s657_s29  ;;  %p662_p0 = scmp.lt.u32.totalorder %s975_s14, %s1047_s2 }
  0x74   : > { %p663_p1 = scmp.lt.u32.totalorder %s661_s3, %s657_s29  ;;  %p665_p6 = scmp.lt.u32.totalorder %s657_s29, %s975_s14 }
  0x75   : > { %p659_p8 = pnand %p658_p5, %p1064_p11 }
  0x76   : > { %p664_p3 = por %p663_p1, %p662_p0 }
  0x77   : > { %p660_p9 = pneg %p659_p8 }
  0x78   : > { %p666_p12 = por %p665_p6, %p664_p3 }
  0x7a   : > { %p667_p13 = pnand %p666_p12, %p660_p9 }
  0x7c   : > { %670 = shalt.err (!%p667_p13)
}
  0x7d   : > { %555 = dma.vmem_to_hbm [thread:$0]  (%p1064_p11), %s969_s4, 64, %s975_s14, %s401_s19  }
  0x7e   : > { %s396_s7 = scalar_lea.sflag [#allocation4], %s868_s25  ;;  %s671_s8 = scalar_lea.vmem %s967_s30, 512 }
  0x7f   : > { %p672_p7 = scmp.ne.s32.totalorder %s967_s30, %s671_s8  ;;  %s747_s13 = smov [#allocation5]  }
  0x80   : > { %s675_s16 = sshll.u32 %s747_s13, 4  ;;  %s676_s16 = int_to_ptr.vmem [resolvable:$false] %s675_s16 }
  0x81   : > { %p673_p10 = pnand %p672_p7, %p1064_p11  ;;  %s677_s23 = scalar_lea.vmem %s676_s16, 1024 }
  0x82   : > { %p678_p4 = scmp.lt.s32.totalorder %s967_s30, %s676_s16  ;;  %p679_p5 = scmp.lt.s32.totalorder %s677_s23, %s671_s8 }
  0x83   : > { %p674_p2 = pneg %p673_p10 }
  0x84   : > { %p680_p8 = por %p679_p5, %p678_p4 }
  0x86   : > { %p681_p9 = pnand %p680_p8, %p674_p2 }
  0x88   : > { %684 = shalt.err (!%p681_p9)
}
  0x89   : > { %s685_s25 = scalar_lea.hbm %s981_s17, 512  ;;  %s689_s19 = scalar_lea.hbm %s1046_s1, 1024 }
  0x8a   : > { %p686_p0 = scmp.ne.s32.totalorder %s981_s17, %s685_s25  ;;  %p690_p6 = scmp.lt.u32.totalorder %s981_s17, %s1046_s1 }
  0x8b   : > { %p691_p12 = scmp.lt.u32.totalorder %s689_s19, %s685_s25  ;;  %p693_p7 = scmp.lt.u32.totalorder %s685_s25, %s981_s17 }
  0x8c   : > { %p687_p1 = pnand %p686_p0, %p1064_p11 }
  0x8d   : > { %p692_p13 = por %p691_p12, %p690_p6 }
  0x8e   : > { %p688_p3 = pneg %p687_p1 }
  0x8f   : > { %p694_p10 = por %p693_p7, %p692_p13 }
  0x91   : > { %p695_p2 = pnand %p694_p10, %p688_p3 }
  0x93   : > { %698 = shalt.err (!%p695_p2)
}
  0x94   : > { %554 = dma.vmem_to_hbm [thread:$0]  (%p1064_p11), %s967_s30, 512, %s981_s17, %s396_s7  }
  0x95 PF: > { %s441_s27 = sand.u32 1, %s729_s9   ;;  %p1065_p4 = scmp.ne.s32.totalorder %s1052_s22, 0 }
  0x96   : > { %p1066_p5 = scmp.ge.s32.totalorder %s741_s12, 2  ;;  %s442_s29 = scalar_lea.sflag [#allocation4], %s441_s27 }
  0x98   : > { %p563_p8 = pnand %p1066_p5, %p1065_p4 }
  0x9a   : > { %720 = dma.done.wait (!%p563_p8), %s442_s29, 512  }
  0x9b   : > { %722 = vsyncadd (!%p563_p8), %s442_s29, 4294966784  ;;  %s451_s20 = scalar_lea.sflag [#allocation7], %s441_s27 }
  0x9c   : > { %724 = dma.done.wait (!%p563_p8), %s451_s20, 64  }
  0x9d   : > { %726 = vsyncadd (!%p563_p8), %s451_s20, 4294967232  ;;  %p19_p11 = scmp.ge.s32.totalorder %s788_s15, 4   ;;  %s1067_s9 = smov %s733_s10 }
  0x9e   : > { %s1068_s10 = smov %s737_s11  ;;  %s1069_s11 = smov %s800_s18 }
  0x9f   : > { %s1070_s12 = smov %s788_s15  ;;  %21 = sbr.rel (!%p19_p11) target bundleno = 7 (0x7), region = 86 }
  0xa6   :  { %456 = vsyncpa [#allocation3], 1 }
  0xa7   :  { %458 = vsyncpa [#allocation3 + $0x1], 1 }
  0xa8   :  { %459 = vsyncpa [#allocation4], 1 }
  0xa9   :  { %461 = vsyncpa [#allocation4 + $0x1], 1 }
  0xaa   :  { %462 = vsyncpa [#allocation7], 1 }
  0xab   :  { %464 = vsyncpa [#allocation7 + $0x1], 1 }

</bundles_post_ra>
